<compile_context>
chip_gen: v7x
topology: tpu7x:2x2x1
jax: 0.10.0
libtpu: 0.0.40
codegen_flags: <defaults>
</compile_context>

<pallas_src>
import functools

import jax
import jax.numpy as jnp
from jax.experimental import pallas as pl
from jax.experimental.pallas import tpu as pltpu

LANES = 128
SUBLANES = 8
VREG_ELEMS = SUBLANES * LANES          # 1024 elements per vreg
MAX_BLOCK_ROWS = 2048                  # (2048, 128) f32 == 1 MiB per block


def _pointwise_loss(x_f32, target, use_lsgan):
    """Per-element GAN loss for a compile-time-constant target value."""
    if use_lsgan:                              # nn.MSELoss elementwise
        d = x_f32 - target
        return d * d
    # nn.BCELoss elementwise (torch clamps each log term at -100).
    if target == 1.0:
        return -jnp.maximum(jnp.log(x_f32), -100.0)
    if target == 0.0:
        return -jnp.maximum(jnp.log(1.0 - x_f32), -100.0)
    logx = jnp.maximum(jnp.log(x_f32), -100.0)
    log1mx = jnp.maximum(jnp.log(1.0 - x_f32), -100.0)
    return -(target * logx + (1.0 - target) * log1mx)


def _gan_loss_kernel(x_ref, out_ref, acc_ref, *, target, use_lsgan,
                     blocks_per_split, num_blocks, valid_rows_last,
                     needs_mask):
    """Accumulate one (block_rows,128) block into a resident (8,128) partial."""
    c = pl.program_id(0)            # split axis (candidate per-TensorCore)
    i = pl.program_id(1)            # sequential blocks within the split

    @pl.when(i == 0)
    def _():
        acc_ref[...] = jnp.zeros_like(acc_ref)

    x = x_ref[...].astype(jnp.float32)         # in-kernel upcast: bf16 streams
    val = _pointwise_loss(x, target, use_lsgan)

    def _accum(v):
        # vreg-shaped accumulation: pure VALU adds, no per-step XLU reduce.
        acc_ref[...] += jnp.sum(v.reshape(-1, SUBLANES, LANES), axis=0)

    if needs_mask:
        # Only the single global last block is partial; every other block
        # takes the unmasked fast path.  The mask is a block-relative row
        # (sublane) threshold: one iota + compare + select, small int32.
        block_idx = c * blocks_per_split + i
        is_last = block_idx == num_blocks - 1

        @pl.when(block_idx < num_blocks - 1)
        def _():
            _accum(val)

        @pl.when(is_last)
        def _():
            row = jax.lax.broadcasted_iota(jnp.int32, val.shape, 0)
            _accum(jnp.where(row < valid_rows_last, val, 0.0))
    else:
        _accum(val)

    # Fused epilogue: collapse the (8,128) accumulator to a lane-dense
    # (1,128) partial in-kernel on the last sequential step (XLU is idle
    # here); the wrapper only does the tiny cross-split add and the /N.
    @pl.when(i == blocks_per_split - 1)
    def _():
        out_ref[...] = jnp.sum(acc_ref[...], axis=0,
                               keepdims=True).reshape(1, 1, LANES)


def _gan_loss_pallas(x, target_value, use_lsgan, *,
                     max_block_rows=MAX_BLOCK_ROWS):
    """Scalar GAN loss = mean-reduced MSE (or BCE) of x vs a constant target."""
    total_n = x.size
    target = float(target_value)
    flat = x.reshape(-1)                       # free reshape, native dtype

    # Kernel handles the vreg-aligned prefix; the <=1023-element ragged tail
    # is a tiny fused jnp expression (no full-tensor jnp.pad copy anymore).
    aligned_n = (total_n // VREG_ELEMS) * VREG_ELEMS

    prefix_sum = jnp.float32(0.0)
    if aligned_n > 0:
        prefix = flat if aligned_n == total_n else flat[:aligned_n]
        # TODO(synk): for ragged sizes XLA may still materialize this prefix
        # slice; if it shows up in the HLO, route it through
        # CompilerParams(allow_input_fusion=...) instead of a separate copy.
        rows = aligned_n // LANES              # always a multiple of SUBLANES
        x2d = prefix.reshape(rows, LANES)      # lane-dense, native dtype

        block_rows = min(max_block_rows, rows)
        block_rows = max(SUBLANES, block_rows - block_rows % SUBLANES)
        num_blocks = pl.cdiv(rows, block_rows)
        needs_mask = (rows % block_rows) != 0
        valid_rows_last = rows - (num_blocks - 1) * block_rows

        # 2-way split only when it is exact, so no out-of-range block index
        # is ever emitted; on 1-TC chips it is a near-zero-cost serial split.
        # TODO(synk): on v7x try pltpu.CORE_PARALLEL / pl.core_map and verify
        # in xprof that both TensorCores actually stream.
        num_splits = 2 if (num_blocks >= 2 and num_blocks % 2 == 0) else 1
        blocks_per_split = num_blocks // num_splits

        # Invariants the correctness of the masked tail relies on.
        assert block_rows % SUBLANES == 0 and 0 < block_rows <= rows
        assert num_splits * blocks_per_split == num_blocks
        assert needs_mask == (valid_rows_last != block_rows)

        kernel = functools.partial(
            _gan_loss_kernel,
            target=target,
            use_lsgan=use_lsgan,
            blocks_per_split=blocks_per_split,
            num_blocks=num_blocks,
            valid_rows_last=valid_rows_last,
            needs_mask=needs_mask,
        )

        itemsize = jnp.dtype(x.dtype).itemsize
        if use_lsgan:
            flops, transcendentals = 3 * aligned_n, 0
        elif target in (0.0, 1.0):
            flops, transcendentals = 3 * aligned_n, aligned_n
        else:
            flops, transcendentals = 7 * aligned_n, 2 * aligned_n
        cost = pl.CostEstimate(
            flops=flops, transcendentals=transcendentals,
            bytes_accessed=aligned_n * itemsize + num_splits * LANES * 4)

        partials = pl.pallas_call(
            kernel,
            out_shape=jax.ShapeDtypeStruct((num_splits, 1, LANES),
                                           jnp.float32),
            grid=(num_splits, blocks_per_split),
            in_specs=[pl.BlockSpec(
                (block_rows, LANES),
                lambda c, i: (c * blocks_per_split + i, 0))],
            out_specs=pl.BlockSpec((1, 1, LANES), lambda c, i: (c, 0, 0)),
            scratch_shapes=[pltpu.VMEM((SUBLANES, LANES), jnp.float32)],
            compiler_params=pltpu.CompilerParams(
                dimension_semantics=("parallel", "arbitrary")),
            cost_estimate=cost,
        )(x2d)
        prefix_sum = jnp.sum(partials)

    if aligned_n == total_n:
        tail_sum = jnp.float32(0.0)
    else:
        # TODO(synk): inputs smaller than one vreg (1024 elems) are handled
        # entirely by this fused jnp tail; a Pallas dispatch would cost more.
        tail = flat[aligned_n:].astype(jnp.float32)
        tail_sum = jnp.sum(_pointwise_loss(tail, target, use_lsgan))

    return (prefix_sum + tail_sum) / jnp.float32(total_n)


class GANLoss:
    """JAX/Pallas port of talkingface GANLoss (forward pass only)."""

    def __init__(self, use_lsgan=True, target_real_label=1.0,
                 target_fake_label=0.0):
        self.use_lsgan = use_lsgan
        self.real_label = float(target_real_label)
        self.fake_label = float(target_fake_label)

    def get_target_tensor(self, inp, target_is_real):
        t = self.real_label if target_is_real else self.fake_label
        return jnp.full(inp.shape, t, dtype=inp.dtype)

    def __call__(self, inp, target_is_real):
        target = self.real_label if target_is_real else self.fake_label
        return _gan_loss_pallas(inp, target, self.use_lsgan)


if __name__ == "__main__":
    key = jax.random.PRNGKey(0)
    # Typical discriminator patch output: NCHW = (2, 4, 16, 16)
    x = jax.random.normal(key, (2, 4, 16, 16), dtype=jnp.float32)

    # LSGAN (MSE) path -- default
    lsgan = GANLoss(use_lsgan=True)
    loss_real = jax.block_until_ready(lsgan(x, True))
    loss_fake = jax.block_until_ready(lsgan(x, False))
    assert jnp.allclose(loss_real, jnp.mean((x - 1.0) ** 2),
                        rtol=1e-5, atol=1e-5)
    assert jnp.allclose(loss_fake, jnp.mean(x ** 2), rtol=1e-5, atol=1e-5)

    # BCE path (input must be probabilities)
    probs = jax.nn.sigmoid(x)
    bce = GANLoss(use_lsgan=False)
    loss_bce_real = jax.block_until_ready(bce(probs, True))
    loss_bce_fake = jax.block_until_ready(bce(probs, False))
    assert jnp.allclose(loss_bce_real, -jnp.mean(jnp.log(probs)),
                        rtol=1e-5, atol=1e-5)
    assert jnp.allclose(loss_bce_fake, -jnp.mean(jnp.log(1.0 - probs)),
                        rtol=1e-5, atol=1e-5)

    # Ragged shape + label-smoothed BCE target: the 8192-element aligned
    # prefix goes through the kernel, the 910-element tail through the
    # fused jnp path (2*3*37*41 = 9102 elems, not % 1024).
    y = jax.random.uniform(jax.random.PRNGKey(1), (2, 3, 37, 41),
                           dtype=jnp.float32, minval=0.05, maxval=0.95)
    smooth = GANLoss(use_lsgan=False, target_real_label=0.9)
    loss_smooth = jax.block_until_ready(smooth(y, True))
    ref_smooth = -jnp.mean(0.9 * jnp.log(y) + 0.1 * jnp.log(1.0 - y))
    assert jnp.allclose(loss_smooth, ref_smooth, rtol=1e-5, atol=1e-5)

    # Multi-block path with a small block cap: exercises the exact 2-way
    # split, the per-split accumulator re-init, and the pl.when-gated
    # last-block row mask without needing a large tensor.
    z = jax.random.normal(jax.random.PRNGKey(2), (4, 8, 32, 32),
                          dtype=jnp.float32)
    loss_blk = jax.block_until_ready(
        _gan_loss_pallas(z, 1.0, True, max_block_rows=80))
    assert jnp.allclose(loss_blk, jnp.mean((z - 1.0) ** 2),
                        rtol=1e-5, atol=1e-5)

    # bf16 input streams in its native dtype and is upcast in-kernel.
    xb = x.astype(jnp.bfloat16)
    loss_bf16 = jax.block_until_ready(lsgan(xb, False))
    ref_bf16 = jnp.mean(jnp.square(xb.astype(jnp.float32)))
    assert jnp.allclose(loss_bf16, ref_bf16, rtol=1e-2, atol=1e-3)

    print("KERNEL_OK")
</pallas_src>

<mosaic_0001>
module attributes {stable_mosaic.version = 11 : i64} {
  func.func @_gan_loss_kernel(%arg0: i32, %arg1: i32, %arg2: memref<16x128xf32, #tpu.memory_space<vmem>>, %arg3: memref<1x1x128xf32, #tpu.memory_space<vmem>>, %arg4: memref<8x128xf32, #tpu.memory_space<vmem>>) attributes {dimension_semantics = [#tpu.dimension_semantics<parallel>, #tpu.dimension_semantics<arbitrary>], iteration_bounds = array<i64: 1, 1>, scalar_prefetch = 0 : i64, scratch_operands = 1 : i64, tpu.core_type = #tpu.core_type<tc>, window_params = [{transform_indices = @transform_0, window_bounds = array<i64: 16, 128>}, {transform_indices = @transform_1, window_bounds = array<i64: 1, 1, 128>}]} {
    %c0_i32 = arith.constant 0 : i32
    %0 = arith.cmpi eq, %arg1, %c0_i32 : i32
    %1 = arith.extui %0 : i1 to i32
    %c0_i32_0 = arith.constant 0 : i32
    %2 = arith.cmpi ne, %1, %c0_i32_0 : i32
    scf.if %2 {
      %cst_9 = arith.constant 0.000000e+00 : f32
      %15 = vector.broadcast %cst_9 : f32 to vector<8x128xf32>
      %c0_10 = arith.constant 0 : index
      %c0_11 = arith.constant 0 : index
      %16 = vector.load %arg4[%c0_10, %c0_11] : memref<8x128xf32, #tpu.memory_space<vmem>>, vector<8x128xf32>
      tpu.vector_store %arg4[%c0_10, %c0_11], %15 {strides = array<i32>} : memref<8x128xf32, #tpu.memory_space<vmem>>, vector<8x128xf32>,
    } else {
    }
    %c0 = arith.constant 0 : index
    %c0_1 = arith.constant 0 : index
    %3 = vector.load %arg2[%c0, %c0_1] : memref<16x128xf32, #tpu.memory_space<vmem>>, vector<16x128xf32>
    %cst = arith.constant 1.000000e+00 : f32
    %4 = vector.broadcast %cst : f32 to vector<16x128xf32>
    %5 = arith.subf %3, %4 : vector<16x128xf32>
    %6 = arith.mulf %5, %5 : vector<16x128xf32>
    %c0_2 = arith.constant 0 : index
    %c0_3 = arith.constant 0 : index
    %7 = vector.load %arg4[%c0_2, %c0_3] : memref<8x128xf32, #tpu.memory_space<vmem>>, vector<8x128xf32>
    %8 = vector.shape_cast %6 : vector<16x128xf32> to vector<2x8x128xf32>
    %cst_4 = arith.constant dense<0.000000e+00> : vector<8x128xf32>
    %9 = vector.multi_reduction <add>, %8, %cst_4 [0] : vector<2x8x128xf32> to vector<8x128xf32>
    %10 = arith.addf %7, %9 : vector<8x128xf32>
    %c0_5 = arith.constant 0 : index
    %c0_6 = arith.constant 0 : index
    %11 = vector.load %arg4[%c0_5, %c0_6] : memref<8x128xf32, #tpu.memory_space<vmem>>, vector<8x128xf32>
    tpu.vector_store %arg4[%c0_5, %c0_6], %10 {strides = array<i32>} : memref<8x128xf32, #tpu.memory_space<vmem>>, vector<8x128xf32>,
    %c0_i32_7 = arith.constant 0 : i32
    %12 = arith.cmpi eq, %arg1, %c0_i32_7 : i32
    %13 = arith.extui %12 : i1 to i32
    %c0_i32_8 = arith.constant 0 : i32
    %14 = arith.cmpi ne, %13, %c0_i32_8 : i32
    scf.if %14 {
      %c0_9 = arith.constant 0 : index
      %c0_10 = arith.constant 0 : index
      %15 = vector.load %arg4[%c0_9, %c0_10] : memref<8x128xf32, #tpu.memory_space<vmem>>, vector<8x128xf32>
      %cst_11 = arith.constant dense<0.000000e+00> : vector<128xf32>
      %16 = vector.multi_reduction <add>, %15, %cst_11 [0] : vector<8x128xf32> to vector<128xf32>
      %17 = vector.shape_cast %16 : vector<128xf32> to vector<1x128xf32>
      %18 = vector.shape_cast %17 : vector<1x128xf32> to vector<1x1x128xf32>
      %c0_12 = arith.constant 0 : index
      %c0_13 = arith.constant 0 : index
      %c0_14 = arith.constant 0 : index
      %19 = vector.load %arg3[%c0_12, %c0_13, %c0_14] : memref<1x1x128xf32, #tpu.memory_space<vmem>>, vector<1x1x128xf32>
      tpu.vector_store %arg3[%c0_12, %c0_13, %c0_14], %18 {strides = array<i32>} : memref<1x1x128xf32, #tpu.memory_space<vmem>>, vector<1x1x128xf32>,
    } else {
    }
    return
  }
  func.func @transform_0(%arg0: i32, %arg1: i32) -> (i32, i32) {
    %c1_i32 = arith.constant 1 : i32
    %0 = arith.muli %arg0, %c1_i32 : i32
    %1 = arith.addi %0, %arg1 : i32
    %c0_i32 = arith.constant 0 : i32
    %c0_i32_0 = arith.constant 0 : i32
    return %1, %c0_i32 : i32, i32
  }
  func.func @transform_1(%arg0: i32, %arg1: i32) -> (i32, i32, i32) {
    %c0_i32 = arith.constant 0 : i32
    %c0_i32_0 = arith.constant 0 : i32
    %c0_i32_1 = arith.constant 0 : i32
    return %arg0, %c0_i32, %c0_i32_0 : i32, i32, i32
  }
}

</mosaic_0001>

<bundles_post_ra>
// kernel: tpu_custom_call.1
= control target key start
LH: loop header
LB: loop body
LE: loop exit
PB: predicated region body
PF: predicated region fallthrough
CT: control target
= control target key end

     0   :  { %6 = vsyncpa [#allocation4], 0  ;;  %s162_s0 = inlined_call_operand.hbm [shape: f32[16,128], index: 0, kind: input, shape index: {}]   ;;  %s163_s1 = inlined_call_operand.hbm [shape: f32[1,1,128], index: 1, kind: output, shape index: {}]  }
   0x1   :  { %7 = vsyncpa [#allocation5], 0  ;;  %s124_s6 = smov [#allocation3]   ;;  %s76_s10 = scalar_lea.hbm %s162_s0, 256 }
   0x2   :  { %s17_s7 = sshll.u32 %s124_s6, 4  ;;  %p77_p0 = scmp.ne.s32.totalorder %s162_s0, %s76_s10  ;;  %s18_s7 = int_to_ptr.vmem [resolvable:$true] %s17_s7 }
   0x3   :  { %p80_p1 = scmp.lt.u32.totalorder %s76_s10, %s162_s0 }
   0x5   :  { %p82_p2 = pnand %p80_p1, %p77_p0 }
   0x7   :  { %85 = shalt.err (!%p82_p2)
}
   0x8   :  { %s86_s15 = scalar_lea.vmem %s18_s7, 256  ;;  %p91_p4 = scmp.lt.s32.totalorder %s18_s7, %s18_s7 }
   0x9   :  { %p87_p3 = scmp.ne.s32.totalorder %s18_s7, %s86_s15  ;;  %p92_p5 = scmp.lt.s32.totalorder %s86_s15, %s86_s15 }
   0xb   :  { %p93_p6 = por %p92_p5, %p91_p4 }
   0xd   :  { %p94_p7 = pnand %p93_p6, %p87_p3 }
   0xf   :  { %97 = shalt.err (!%p94_p7)
}
  0x10   :  { %s125_s16 = smov 128   ;;  %s126_s17 = smov 8  }
  0x11   :  { %23 = dma.hbm_to_vmem [thread:$0]  %s162_s0, 256, %s18_s7, [#allocation4], %s125_s16, %s125_s16, %s126_s17  }
  0x12   :  { %120 = dma.done.wait [#allocation4], 256  }
  0x13   :  { %121 = vsyncadd [#allocation4], 4294967040  ;;  %v34_v0 = vld [vmem:[#allocation3] sm:$0xff]  ;;  %v35_v1 = vld [vmem:[#allocation3 + $0x8] sm:$0xff]  ;;  %s127_s20 = smov [#allocation6]  }
  0x14   :  { %v70_v2 = vadd.f32 -1.0, %v34_v0  ;;  %v71_v3 = vadd.f32 -1.0, %v35_v1  ;;  %s61_s21 = sshll.u32 %s127_s20, 4  ;;  %s62_s21 = int_to_ptr.vmem [resolvable:$true] %s61_s21 }
  0x15   :  { %s98_s0 = scalar_lea.vmem %s62_s21, 16  ;;  %s102_s22 = scalar_lea.vmem %s62_s21, 32 }
  0x16   :  { %v38_v4 = vmul.f32 %v70_v2, %v70_v2  ;;  %v39_v5 = vmul.f32 %v71_v3, %v71_v3  ;;  %p99_p8 = scmp.ne.s32.totalorder %s62_s21, %s98_s0  ;;  %p103_p9 = scmp.lt.s32.totalorder %s62_s21, %s62_s21 }
  0x17   :  { %p104_p10 = scmp.lt.s32.totalorder %s102_s22, %s98_s0 }
  0x18   :  { %v41_v6 = vadd.f32 %v39_v5, %v38_v4 }
  0x19   :  { %p105_p11 = por %p104_p10, %p103_p9 }
  0x1a   :  { %v48_v7 = vrot.slane %v41_v6, 4 }
  0x1b   :  { %p106_p12 = pnand %p105_p11, %p99_p8 }
  0x1c   :  { %v49_v8 = vadd.f32 %v48_v7, %v41_v6 }
  0x1e   :  { %v50_v9 = vrot.slane %v49_v8, 2 }
  0x20   :  { %v51_v10 = vadd.f32 %v50_v9, %v49_v8 }
  0x22   :  { %v52_v11 = vrot.slane %v51_v10, 1 }
  0x24   :  { %v53_v12 = vadd.f32 %v52_v11, %v51_v10 }
  0x26   :  { %54 = vst [vmem:[#allocation6] sm:$0x1] %v53_v12 }
  0x27   :  { %109 = shalt.err (!%p106_p12)
}
  0x28   :  { %s110_s25 = scalar_lea.hbm %s163_s1, 16 }
  0x29   :  { %p111_p13 = scmp.ne.s32.totalorder %s163_s1, %s110_s25  ;;  %p114_p0 = scmp.lt.u32.totalorder %s110_s25, %s163_s1 }
  0x2b   :  { %p116_p1 = pnand %p114_p0, %p111_p13 }
  0x2d   :  { %119 = shalt.err (!%p116_p1)
}
  0x2e   :  { %64 = dma.vmem_to_hbm [thread:$0]  %s62_s21, 16, %s163_s1, [#allocation5]  }
  0x2f   :  { %122 = dma.done.wait [#allocation5], 16  }
  0x30   :  { %123 = vsyncadd [#allocation5], 4294967280 }
  0x31   :  { %68 = vsyncpa [#allocation4], 1 }
  0x32   :  { %69 = vsyncpa [#allocation5], 1 }

</bundles_post_ra>
